<compile_context>
chip_gen: v5e
topology: v5e:2x2
jax: 0.10.0
libtpu: 0.0.40
codegen_flags: <defaults>
</compile_context>

<pallas_src>
import jax
import jax.numpy as jnp
from jax.experimental import pallas as pl
from jax.experimental.pallas import tpu as pltpu


# ----------------------------------------------------------------------------
# Pallas kernel: batch-tile MLP (3 folded conv+BN+ReLU) + attention pooling.
# ----------------------------------------------------------------------------
def _anchor_point_kernel(x_ref, w1_ref, b1_ref, w2_ref, b2_ref, w3_ref, b3_ref,
                         wa_ref, vec_ref, attn_ref):
    TB, N = attn_ref.shape                      # batch tile, points per batch
    Cout = w3_ref.shape[1]

    # ---- three (1x1 conv + folded BN + ReLU) as one flat matmul chain ------
    # All TB*N points of this tile go through a single (TB*N, .) matmul so the
    # MXU sees a real M dimension.  x is already bf16 (cast in the wrapper);
    # accumulation and all VPU math stay f32.
    x = x_ref[...]                                            # (TB*N, Fin) bf16

    h = jnp.dot(x, w1_ref[...],
                preferred_element_type=jnp.float32) + b1_ref[...]
    h = jnp.maximum(h, 0.0)                                   # (TB*N, H1) f32

    h = jnp.dot(h.astype(w2_ref.dtype), w2_ref[...],
                preferred_element_type=jnp.float32) + b2_ref[...]
    h = jnp.maximum(h, 0.0)                                   # (TB*N, H2) f32

    h = jnp.dot(h.astype(w3_ref.dtype), w3_ref[...],
                preferred_element_type=jnp.float32) + b3_ref[...]
    h = jnp.maximum(h, 0.0)                                   # (TB*N, Cout) f32

    h3 = h.reshape(TB, N, Cout)                               # per-batch view

    # ---- attention logits: VPU multiply + lane reduce (no width-1 matmul) --
    # Attention bias is omitted: softmax is shift-invariant, so it cancels.
    wa = wa_ref[...]                                          # (1, Cout) f32
    logits = jnp.sum(h3 * wa[None, :, :], axis=-1)            # (TB, N)

    # ---- softmax over the point axis (lane axis -> lane-dense output) ------
    m = jnp.max(logits, axis=-1, keepdims=True)
    e = jnp.exp(logits - m)
    inv = pl.reciprocal(jnp.sum(e, axis=-1, keepdims=True), approx=True)  # EUP
    attn = e * inv                                            # (TB, N) f32
    attn_ref[...] = attn

    # ---- attention pooling: f32 VPU multiply + sublane reduce over N --------
    vec_ref[...] = jnp.sum(h3 * attn[:, :, None], axis=1)     # (TB, Cout) f32


def _choose_tiling(B, N, target_rows):
    """Pick (TB, B_pad).

    TB*N rows are processed per grid step.  Either TB == B (single tile,
    block dim equals the full array dim -> always layout-legal) or TB is a
    multiple of 8 and B is padded up to a multiple of TB so every block
    satisfies the (8, 128) sublane constraint and no degenerate TB=1 path
    exists for prime/odd B.
    """
    max_tb = max(1, target_rows // N)
    if B <= max_tb:
        return B, B                       # one tile covers the whole batch
    tb = max(8, (max_tb // 8) * 8)        # multi-tile: sublane-aligned TB
    n_tiles = -(-B // tb)                 # ceil
    return tb, n_tiles * tb


def anchor_point_net(x, params, *, matmul_dtype=jnp.bfloat16, target_rows=4096):
    """x: (B, N, F_in) f32 -> (attn_vec (B, C_out), attn_weights (B, N, 1))."""
    B, N, Fin = x.shape
    w1 = params["w1"].astype(matmul_dtype)
    w2 = params["w2"].astype(matmul_dtype)
    w3 = params["w3"].astype(matmul_dtype)
    b1, b2, b3 = params["b1"], params["b2"], params["b3"]
    wa = params["wa"]
    Cout = w3.shape[1]

    TB, B_pad = _choose_tiling(B, N, target_rows)
    grid = (B_pad // TB,)

    # flatten points + cast to bf16 in the wrapper; pad batch to TB multiple.
    # Padded rows are zeros -> valid (ReLU/softmax well-defined) and sliced
    # off after the call, so the result is exact.
    x_flat = x.reshape(B * N, Fin).astype(matmul_dtype)
    if B_pad != B:
        x_flat = jnp.pad(x_flat, ((0, (B_pad - B) * N), (0, 0)))

    def whole(arr):  # whole-array block, independent of the grid index
        nd = arr.ndim
        return pl.BlockSpec(arr.shape, lambda b, _nd=nd: (0,) * _nd)

    grid_spec = pltpu.PrefetchScalarGridSpec(
        num_scalar_prefetch=0,
        grid=grid,
        in_specs=[
            pl.BlockSpec((TB * N, Fin), lambda b: (b, 0)),        # x rows tile
            whole(w1), whole(b1),
            whole(w2), whole(b2),
            whole(w3), whole(b3),
            whole(wa),
        ],
        out_specs=[
            pl.BlockSpec((TB, Cout), lambda b: (b, 0)),           # attn_vec
            pl.BlockSpec((TB, N), lambda b: (b, 0)),              # attn, lane-dense
        ],
    )

    out_shape = (
        jax.ShapeDtypeStruct((B_pad, Cout), jnp.float32),
        jax.ShapeDtypeStruct((B_pad, N), jnp.float32),
    )

    vec, attn = pl.pallas_call(
        _anchor_point_kernel,
        out_shape=out_shape,
        grid_spec=grid_spec,
        compiler_params=pltpu.CompilerParams(
            dimension_semantics=("parallel",)),
    )(x_flat, w1, b1, w2, b2, w3, b3, wa)

    vec = vec[:B]
    attn = attn[:B]
    # module contract: attn_weights is (B, N, 1)
    return vec, attn.reshape(B, N, 1)


# ----------------------------------------------------------------------------
# Deterministic parameter construction (plain-JAX glue).
# Conv1d(k=1) weight (C_out, C_in, 1) is stored transposed as (C_in, C_out);
# BatchNorm (eval mode) is folded into the conv affine; hidden widths are
# zero-padded to 64 lanes for the kernel (numerically exact).
# TODO(synk): training-mode BatchNorm (batch statistics + running-stat update)
# has no in-kernel equivalent here; eval-mode folding only.
# ----------------------------------------------------------------------------
def _fold_conv_bn(key, c_in, c_out, eps=1e-5):
    kw, kb, kg, kbt, km, kv = jax.random.split(key, 6)
    w = jax.random.normal(kw, (c_in, c_out), jnp.float32) * 0.1
    b = jax.random.normal(kb, (1, c_out), jnp.float32) * 0.1
    gamma = 1.0 + 0.1 * jax.random.normal(kg, (c_out,), jnp.float32)
    beta = 0.1 * jax.random.normal(kbt, (c_out,), jnp.float32)
    mean = 0.1 * jax.random.normal(km, (c_out,), jnp.float32)
    var = 1.0 + 0.1 * jax.random.uniform(kv, (c_out,), jnp.float32)
    scale = gamma / jnp.sqrt(var + eps)
    w_eff = w * scale[None, :]
    b_eff = (b - mean[None, :]) * scale[None, :] + beta[None, :]
    return w_eff, b_eff


def _pad_last(a, to):
    return jnp.pad(a, [(0, 0)] * (a.ndim - 1) + [(0, to - a.shape[-1])])


def _pad_first(a, to):
    return jnp.pad(a, [(0, to - a.shape[0])] + [(0, 0)] * (a.ndim - 1))


def make_params(key, f_in, c_out_final, h1=32, h2=48, h_pad=64):
    k1, k2, k3, ka, kab = jax.random.split(key, 5)
    w1, b1 = _fold_conv_bn(k1, f_in, h1)
    w2, b2 = _fold_conv_bn(k2, h1, h2)
    w3, b3 = _fold_conv_bn(k3, h2, c_out_final)
    wa = jax.random.normal(ka, (1, c_out_final), jnp.float32) * 0.1  # Linear(C,1)
    ba = jax.random.normal(kab, (1, 1), jnp.float32) * 0.1
    return dict(
        # lane-friendly zero-padded weights used by the kernel
        w1=_pad_last(w1, h_pad), b1=_pad_last(b1, h_pad),
        w2=_pad_last(_pad_first(w2, h_pad), h_pad), b2=_pad_last(b2, h_pad),
        w3=_pad_first(w3, h_pad), b3=b3,
        wa=wa, ba=ba,   # ba only used by the reference (softmax cancels it)
        # un-padded originals for the pure-JAX reference
        w1_raw=w1, b1_raw=b1, w2_raw=w2, b2_raw=b2, w3_raw=w3, b3_raw=b3,
    )


# ----------------------------------------------------------------------------
# Pure-JAX reference (same bf16-matmul / f32-accumulate arithmetic,
# includes the attention bias to verify that dropping it in-kernel is exact).
# ----------------------------------------------------------------------------
def reference(x, p, matmul_dtype=jnp.bfloat16):
    def mm(a, w):
        return jnp.dot(a.astype(matmul_dtype), w.astype(matmul_dtype),
                       preferred_element_type=jnp.float32)
    h = jnp.maximum(mm(x, p["w1_raw"]) + p["b1_raw"], 0.0)
    h = jnp.maximum(mm(h, p["w2_raw"]) + p["b2_raw"], 0.0)
    h = jnp.maximum(mm(h, p["w3_raw"]) + p["b3_raw"], 0.0)            # (B,N,C)
    logits = jnp.sum(h * p["wa"][None, :, :], axis=-1, keepdims=True) + p["ba"][0, 0]
    attn = jax.nn.softmax(logits, axis=1)                             # (B,N,1)
    vec = jnp.sum(h * attn, axis=1)                                   # (B,C)
    return vec, attn


if __name__ == "__main__":
    # cfg: out_feauture_BaseModule=24, coordinate_feature=5 -> F_in = 24+5+3 = 32
    #      out_feature_AnchorPointNet = 64
    B, N, F_IN, C_OUT = 2, 16, 32, 64

    key = jax.random.PRNGKey(0)
    kx, kp = jax.random.split(key)
    x = jax.random.normal(kx, (B, N, F_IN), jnp.float32)
    params = make_params(kp, F_IN, C_OUT)

    attn_vec, attn_weights = anchor_point_net(x, params)
    attn_vec = jax.block_until_ready(attn_vec)
    attn_weights = jax.block_until_ready(attn_weights)

    ref_vec, ref_attn = reference(x, params)
    assert attn_vec.shape == (B, C_OUT)
    assert attn_weights.shape == (B, N, 1)
    # 3e-3: bf16 matmul rounding is shared with the reference; residual slack
    # covers the EUP approx reciprocal in the softmax denominator.
    assert jnp.allclose(attn_vec, ref_vec, atol=3e-3, rtol=3e-3), \
        float(jnp.max(jnp.abs(attn_vec - ref_vec)))
    assert jnp.allclose(attn_weights, ref_attn, atol=3e-3, rtol=3e-3), \
        float(jnp.max(jnp.abs(attn_weights - ref_attn)))

    print("KERNEL_OK")
</pallas_src>

<mosaic_0001>
module attributes {stable_mosaic.version = 11 : i64} {
  func.func @_anchor_point_kernel(%arg0: i32, %arg1: memref<32x32xbf16, #tpu.memory_space<vmem>>, %arg2: memref<32x64xbf16, #tpu.memory_space<vmem>>, %arg3: memref<1x64xf32, #tpu.memory_space<vmem>>, %arg4: memref<64x64xbf16, #tpu.memory_space<vmem>>, %arg5: memref<1x64xf32, #tpu.memory_space<vmem>>, %arg6: memref<64x64xbf16, #tpu.memory_space<vmem>>, %arg7: memref<1x64xf32, #tpu.memory_space<vmem>>, %arg8: memref<1x64xf32, #tpu.memory_space<vmem>>, %arg9: memref<2x64xf32, #tpu.memory_space<vmem>>, %arg10: memref<2x16xf32, #tpu.memory_space<vmem>>) attributes {dimension_semantics = [#tpu.dimension_semantics<parallel>], iteration_bounds = array<i64: 1>, scalar_prefetch = 0 : i64, scratch_operands = 0 : i64, tpu.core_type = #tpu.core_type<tc>, window_params = [{transform_indices = @transform_0, window_bounds = array<i64: 32, 32>}, {pipeline_mode = #tpu.pipeline_mode<synchronous>, transform_indices = @transform_1, window_bounds = array<i64: 32, 64>}, {pipeline_mode = #tpu.pipeline_mode<synchronous>, transform_indices = @transform_2, window_bounds = array<i64: 1, 64>}, {pipeline_mode = #tpu.pipeline_mode<synchronous>, transform_indices = @transform_3, window_bounds = array<i64: 64, 64>}, {pipeline_mode = #tpu.pipeline_mode<synchronous>, transform_indices = @transform_4, window_bounds = array<i64: 1, 64>}, {pipeline_mode = #tpu.pipeline_mode<synchronous>, transform_indices = @transform_5, window_bounds = array<i64: 64, 64>}, {pipeline_mode = #tpu.pipeline_mode<synchronous>, transform_indices = @transform_6, window_bounds = array<i64: 1, 64>}, {pipeline_mode = #tpu.pipeline_mode<synchronous>, transform_indices = @transform_7, window_bounds = array<i64: 1, 64>}, {transform_indices = @transform_8, window_bounds = array<i64: 2, 64>}, {transform_indices = @transform_9, window_bounds = array<i64: 2, 16>}]} {
    %c0 = arith.constant 0 : index
    %c0_0 = arith.constant 0 : index
    %0 = vector.load %arg1[%c0, %c0_0] : memref<32x32xbf16, #tpu.memory_space<vmem>>, vector<32x32xbf16>
    %c0_1 = arith.constant 0 : index
    %c0_2 = arith.constant 0 : index
    %1 = vector.load %arg2[%c0_1, %c0_2] : memref<32x64xbf16, #tpu.memory_space<vmem>>, vector<32x64xbf16>
    %cst = arith.constant dense<0.000000e+00> : vector<32x64xf32>
    %2 = tpu.matmul %0, %1, %cst {dimension_numbers = #tpu.dot_dimension_numbers<[1], [0], [0], [1], [0, 0, 1, 1], [], []>} : vector<32x32xbf16>, vector<32x64xbf16>, vector<32x64xf32> -> vector<32x64xf32>
    %c0_3 = arith.constant 0 : index
    %c0_4 = arith.constant 0 : index
    %3 = vector.load %arg3[%c0_3, %c0_4] : memref<1x64xf32, #tpu.memory_space<vmem>>, vector<1x64xf32>
    %4 = vector.broadcast %3 : vector<1x64xf32> to vector<32x64xf32>
    %5 = arith.addf %2, %4 : vector<32x64xf32>
    %cst_5 = arith.constant 0.000000e+00 : f32
    %6 = vector.broadcast %cst_5 : f32 to vector<32x64xf32>
    %7 = arith.maximumf %5, %6 : vector<32x64xf32>
    %8 = arith.truncf %7 : vector<32x64xf32> to vector<32x64xbf16>
    %c0_6 = arith.constant 0 : index
    %c0_7 = arith.constant 0 : index
    %9 = vector.load %arg4[%c0_6, %c0_7] : memref<64x64xbf16, #tpu.memory_space<vmem>>, vector<64x64xbf16>
    %cst_8 = arith.constant dense<0.000000e+00> : vector<32x64xf32>
    %10 = tpu.matmul %8, %9, %cst_8 {dimension_numbers = #tpu.dot_dimension_numbers<[1], [0], [0], [1], [0, 0, 1, 1], [], []>} : vector<32x64xbf16>, vector<64x64xbf16>, vector<32x64xf32> -> vector<32x64xf32>
    %c0_9 = arith.constant 0 : index
    %c0_10 = arith.constant 0 : index
    %11 = vector.load %arg5[%c0_9, %c0_10] : memref<1x64xf32, #tpu.memory_space<vmem>>, vector<1x64xf32>
    %12 = vector.broadcast %11 : vector<1x64xf32> to vector<32x64xf32>
    %13 = arith.addf %10, %12 : vector<32x64xf32>
    %cst_11 = arith.constant 0.000000e+00 : f32
    %14 = vector.broadcast %cst_11 : f32 to vector<32x64xf32>
    %15 = arith.maximumf %13, %14 : vector<32x64xf32>
    %16 = arith.truncf %15 : vector<32x64xf32> to vector<32x64xbf16>
    %c0_12 = arith.constant 0 : index
    %c0_13 = arith.constant 0 : index
    %17 = vector.load %arg6[%c0_12, %c0_13] : memref<64x64xbf16, #tpu.memory_space<vmem>>, vector<64x64xbf16>
    %cst_14 = arith.constant dense<0.000000e+00> : vector<32x64xf32>
    %18 = tpu.matmul %16, %17, %cst_14 {dimension_numbers = #tpu.dot_dimension_numbers<[1], [0], [0], [1], [0, 0, 1, 1], [], []>} : vector<32x64xbf16>, vector<64x64xbf16>, vector<32x64xf32> -> vector<32x64xf32>
    %c0_15 = arith.constant 0 : index
    %c0_16 = arith.constant 0 : index
    %19 = vector.load %arg7[%c0_15, %c0_16] : memref<1x64xf32, #tpu.memory_space<vmem>>, vector<1x64xf32>
    %20 = vector.broadcast %19 : vector<1x64xf32> to vector<32x64xf32>
    %21 = arith.addf %18, %20 : vector<32x64xf32>
    %cst_17 = arith.constant 0.000000e+00 : f32
    %22 = vector.broadcast %cst_17 : f32 to vector<32x64xf32>
    %23 = arith.maximumf %21, %22 : vector<32x64xf32>
    %24 = vector.shape_cast %23 : vector<32x64xf32> to vector<2x16x64xf32>
    %c0_18 = arith.constant 0 : index
    %c0_19 = arith.constant 0 : index
    %25 = vector.load %arg8[%c0_18, %c0_19] : memref<1x64xf32, #tpu.memory_space<vmem>>, vector<1x64xf32>
    %26 = vector.shape_cast %25 : vector<1x64xf32> to vector<1x1x64xf32>
    %27 = vector.broadcast %26 : vector<1x1x64xf32> to vector<2x16x64xf32>
    %28 = arith.mulf %24, %27 : vector<2x16x64xf32>
    %cst_20 = arith.constant dense<0.000000e+00> : vector<2x16xf32>
    %29 = vector.multi_reduction <add>, %28, %cst_20 [2] : vector<2x16x64xf32> to vector<2x16xf32>
    %cst_21 = arith.constant dense<0xFF800000> : vector<2xf32>
    %30 = vector.multi_reduction <maximumf>, %29, %cst_21 [1] : vector<2x16xf32> to vector<2xf32>
    %31 = vector.shape_cast %30 : vector<2xf32> to vector<2x1xf32>
    %32 = vector.broadcast %31 : vector<2x1xf32> to vector<2x16xf32>
    %33 = arith.subf %29, %32 : vector<2x16xf32>
    %34 = math.exp %33 : vector<2x16xf32>
    %cst_22 = arith.constant dense<0.000000e+00> : vector<2xf32>
    %35 = vector.multi_reduction <add>, %34, %cst_22 [1] : vector<2x16xf32> to vector<2xf32>
    %36 = vector.shape_cast %35 : vector<2xf32> to vector<2x1xf32>
    %37 = tpu.reciprocal %36 {approx = true} : vector<2x1xf32> -> vector<2x1xf32>
    %38 = vector.broadcast %37 : vector<2x1xf32> to vector<2x16xf32>
    %39 = arith.mulf %34, %38 : vector<2x16xf32>
    %c0_23 = arith.constant 0 : index
    %c0_24 = arith.constant 0 : index
    %40 = vector.load %arg10[%c0_23, %c0_24] : memref<2x16xf32, #tpu.memory_space<vmem>>, vector<2x16xf32>
    tpu.vector_store %arg10[%c0_23, %c0_24], %39 {strides = array<i32>} : memref<2x16xf32, #tpu.memory_space<vmem>>, vector<2x16xf32>,
    %41 = vector.shape_cast %39 : vector<2x16xf32> to vector<2x16x1xf32>
    %42 = vector.broadcast %41 : vector<2x16x1xf32> to vector<2x16x64xf32>
    %43 = arith.mulf %24, %42 : vector<2x16x64xf32>
    %cst_25 = arith.constant dense<0.000000e+00> : vector<2x64xf32>
    %44 = vector.multi_reduction <add>, %43, %cst_25 [1] : vector<2x16x64xf32> to vector<2x64xf32>
    %c0_26 = arith.constant 0 : index
    %c0_27 = arith.constant 0 : index
    %45 = vector.load %arg9[%c0_26, %c0_27] : memref<2x64xf32, #tpu.memory_space<vmem>>, vector<2x64xf32>
    tpu.vector_store %arg9[%c0_26, %c0_27], %44 {strides = array<i32>} : memref<2x64xf32, #tpu.memory_space<vmem>>, vector<2x64xf32>,
    return
  }
  func.func @transform_0(%arg0: i32) -> (i32, i32) {
    %c0_i32 = arith.constant 0 : i32
    %c0_i32_0 = arith.constant 0 : i32
    return %arg0, %c0_i32 : i32, i32
  }
  func.func @transform_1(%arg0: i32) -> (i32, i32) {
    %c0_i32 = arith.constant 0 : i32
    %c0_i32_0 = arith.constant 0 : i32
    %c0_i32_1 = arith.constant 0 : i32
    return %c0_i32, %c0_i32_0 : i32, i32
  }
  func.func @transform_2(%arg0: i32) -> (i32, i32) {
    %c0_i32 = arith.constant 0 : i32
    %c0_i32_0 = arith.constant 0 : i32
    %c0_i32_1 = arith.constant 0 : i32
    return %c0_i32, %c0_i32_0 : i32, i32
  }
  func.func @transform_3(%arg0: i32) -> (i32, i32) {
    %c0_i32 = arith.constant 0 : i32
    %c0_i32_0 = arith.constant 0 : i32
    %c0_i32_1 = arith.constant 0 : i32
    return %c0_i32, %c0_i32_0 : i32, i32
  }
  func.func @transform_4(%arg0: i32) -> (i32, i32) {
    %c0_i32 = arith.constant 0 : i32
    %c0_i32_0 = arith.constant 0 : i32
    %c0_i32_1 = arith.constant 0 : i32
    return %c0_i32, %c0_i32_0 : i32, i32
  }
  func.func @transform_5(%arg0: i32) -> (i32, i32) {
    %c0_i32 = arith.constant 0 : i32
    %c0_i32_0 = arith.constant 0 : i32
    %c0_i32_1 = arith.constant 0 : i32
    return %c0_i32, %c0_i32_0 : i32, i32
  }
  func.func @transform_6(%arg0: i32) -> (i32, i32) {
    %c0_i32 = arith.constant 0 : i32
    %c0_i32_0 = arith.constant 0 : i32
    %c0_i32_1 = arith.constant 0 : i32
    return %c0_i32, %c0_i32_0 : i32, i32
  }
  func.func @transform_7(%arg0: i32) -> (i32, i32) {
    %c0_i32 = arith.constant 0 : i32
    %c0_i32_0 = arith.constant 0 : i32
    %c0_i32_1 = arith.constant 0 : i32
    return %c0_i32, %c0_i32_0 : i32, i32
  }
  func.func @transform_8(%arg0: i32) -> (i32, i32) {
    %c0_i32 = arith.constant 0 : i32
    %c0_i32_0 = arith.constant 0 : i32
    return %arg0, %c0_i32 : i32, i32
  }
  func.func @transform_9(%arg0: i32) -> (i32, i32) {
    %c0_i32 = arith.constant 0 : i32
    %c0_i32_0 = arith.constant 0 : i32
    return %arg0, %c0_i32 : i32, i32
  }
}

</mosaic_0001>

<bundles_post_ra>
// kernel: tpu_custom_call.1
= control target key start
LH: loop header
LB: loop body
LE: loop exit
PB: predicated region body
PF: predicated region fallthrough
CT: control target
= control target key end

     0   :  { %15 = vsyncpa [#allocation3], 0  ;;  %s892_s0 = inlined_call_operand.hbm [shape: bf16[32,32], index: 0, kind: input, shape index: {}]   ;;  %s893_s1 = inlined_call_operand.hbm [shape: bf16[32,64], index: 1, kind: input, shape index: {}]   ;;  %s894_s2 = inlined_call_operand.vmem [shape: f32[1,64], index: 2, kind: input, shape index: {}]   ;;  %s895_s3 = inlined_call_operand.hbm [shape: bf16[64,64], index: 3, kind: input, shape index: {}]   ;;  %s896_s4 = inlined_call_operand.vmem [shape: f32[1,64], index: 4, kind: input, shape index: {}]   ;;  %s897_s5 = inlined_call_operand.hbm [shape: bf16[64,64], index: 5, kind: input, shape index: {}]   ;;  %s898_s6 = inlined_call_operand.vmem [shape: f32[1,64], index: 6, kind: input, shape index: {}]   ;;  %s899_s7 = inlined_call_operand.vmem [shape: f32[1,64], index: 7, kind: input, shape index: {}]   ;;  %s900_s8 = inlined_call_operand.hbm [shape: f32[2,64], index: 8, kind: output, shape index: {0}]   ;;  %s901_s9 = inlined_call_operand.hbm [shape: f32[2,16], index: 9, kind: output, shape index: {1}]  }
   0x1   :  { %16 = vsyncpa [#allocation6], 0 }
   0x2   :  { %17 = vsyncpa [#allocation9], 0 }
   0x3   :  { %18 = vsyncpa [#allocation4], 0 }
   0x4   :  { %19 = vsyncpa [#allocation12], 0  ;;  %s37_s11 = sshll.u32 %s893_s1, 4  ;;  %s733_s12 = smov [#allocation5]   ;;  %s38_s11 = int_to_ptr.hbm [resolvable:$true] %s37_s11 }
   0x5   :  { %s39_s13 = sshll.u32 %s733_s12, 4  ;;  %s24_s16 = sshll.u32 %s892_s0, 4  ;;  %s40_s13 = int_to_ptr.vmem [resolvable:$true] %s39_s13  ;;  %s25_s16 = int_to_ptr.hbm [resolvable:$true] %s24_s16 }
   0x6   :  { %s734_s17 = smov 64   ;;  %s735_s18 = smov 4  }
   0x7   :  { %45 = dma.hbm_to_vmem [thread:$0]  %s38_s11, 256, %s40_s13, [#allocation6], %s734_s17, %s734_s17, %s735_s18  }
   0x8   :  { %s736_s19 = smov [#allocation2]   ;;  %s52_s23 = sshll.u32 %s895_s3, 4  ;;  %s53_s23 = int_to_ptr.hbm [resolvable:$true] %s52_s23 }
   0x9   :  { %s26_s20 = sshll.u32 %s736_s19, 4  ;;  %s67_s25 = sshll.u32 %s897_s5, 4  ;;  %s27_s20 = int_to_ptr.vmem [resolvable:$true] %s26_s20  ;;  %s68_s25 = int_to_ptr.hbm [resolvable:$true] %s67_s25 }
   0xa   :  { %32 = dma.hbm_to_vmem [thread:$0]  %s25_s16, 256, %s27_s20, [#allocation3], %s734_s17, %s734_s17, %s735_s18  }
   0xb   :  { %s737_s26 = smov [#allocation7]   ;;  %s738_s0 = smov [#allocation8]  }
   0xc   :  { %s54_s27 = sshll.u32 %s737_s26, 4  ;;  %s69_s28 = sshll.u32 %s738_s0, 4  ;;  %s55_s27 = int_to_ptr.vmem [resolvable:$true] %s54_s27  ;;  %s70_s28 = int_to_ptr.vmem [resolvable:$true] %s69_s28 }
   0xd   :  { %60 = dma.hbm_to_vmem [thread:$0]  %s53_s23, 512, %s55_s27, [#allocation6], %s734_s17, %s734_s17, %s735_s18  }
   0xe   :  { %75 = dma.hbm_to_vmem [thread:$0]  %s68_s25, 512, %s70_s28, [#allocation9], %s734_s17, %s734_s17, %s735_s18  }
   0xf   :  { %723 = dma.done.wait [#allocation3], 256  }
  0x10   :  { %724 = vsyncadd [#allocation3], 4294967040 }
  0x11   :  { %725 = dma.done.wait [#allocation6], 768  }
  0x12   :  { %726 = vsyncadd [#allocation6], 4294966528 }
  0x13   :  { %727 = dma.done.wait [#allocation9], 512  }
  0x14   :  { %728 = vsyncadd [#allocation9], 4294966784  ;;  %v540_v0 = vld [vmem:[#allocation5 + $0x8] sm:$0xff]  ;;  %v539_v1 = vld [vmem:[#allocation5] sm:$0xff]  ;;  %vm131_vm0 = vcmask 261120   ;;  %vm199_vm1 = vcmask 523264  }
  0x15   :  { %144 = vmatpush.bf16.msra.mxu0 %v540_v0  ;;  %v537_v2 = vld [vmem:[#allocation2] sm:$0xff]  ;;  %v538_v3 = vld [vmem:[#allocation2 + $0x8] sm:$0xff]  ;;  %v544_v4 = vld [vmem:[#allocation7 + $0x18] sm:$0xff]  ;;  %vm325_vm2 = vcmask 130112   ;;  %vm330_vm3 = vcmask 1041409   ;;  %vm333_vm4 = vcmask 123904  }
  0x16   :  { %210 = vmatpush.bf16.msra.mxu1 %v544_v4  ;;  %549 = vmatpush.bf16.msra.mxu3 %v544_v4  ;;  %v543_v5 = vld [vmem:[#allocation7 + $0x10] sm:$0xff]  ;;  %v542_v6 = vld [vmem:[#allocation7 + $0x8] sm:$0xff]  ;;  %v541_v7 = vld [vmem:[#allocation7] sm:$0xff]  ;;  %s466_s14 = sshll.u32 %s901_s9, 4  ;;  %s741_s9 = smov [#allocation10]   ;;  %vm446_vm5 = vcmask 517120   ;;  %s467_s14 = int_to_ptr.hbm [resolvable:$true] %s466_s14 }
  0x17   :  { %v565_v9 = vld [vmem:[%s894_s2] ss:$0 sm:$0xff]  ;;  %v548_v23 = vld [vmem:[#allocation8 + $0x18] sm:$0xff]  ;;  %v547_v24 = vld [vmem:[#allocation8 + $0x10] sm:$0xff]  ;;  %s453_s15 = sshll.u32 %s741_s9, 4  ;;  %s455_s18 = sshll.u32 %s900_s8, 4  ;;  %s454_s15 = int_to_ptr.vmem [resolvable:$true] %s453_s15  ;;  %s456_s18 = int_to_ptr.hbm [resolvable:$true] %s455_s18 }
  0x18   :  { %277 = vmatpush.bf16.msra.mxu2 %v548_v23  ;;  %v546_v25 = vld [vmem:[#allocation8 + $0x8] sm:$0xff]  ;;  %v545_v26 = vld [vmem:[#allocation8] sm:$0xff] }
  0x19   :  { %145 = vmatpush.bf16.msra.mxu0 %v539_v1  ;;  %v566_v28 = vld [vmem:[%s896_s4] ss:$0 sm:$0xff]  ;;  %v320_v1 = vlaneseq }
  0x1a   :  { %211 = vmatpush.bf16.msra.mxu1 %v543_v5  ;;  %550 = vmatpush.bf16.msra.mxu3 %v543_v5  ;;  %v567_v42 = vld [vmem:[%s898_s6] ss:$0 sm:$0xff]  ;;  %s740_s6 = smov [#allocation11]  }
  0x1b   :  { %v568_v45 = vld [vmem:[%s899_s7] ss:$0 sm:$0xff]  ;;  %s464_s7 = sshll.u32 %s740_s6, 4  ;;  %s465_s7 = int_to_ptr.vmem [resolvable:$true] %s464_s7 }
  0x1c   :  { %499 = vmatmul.msk.bf16.vlgmr.msra.gmra.mxu0 %vm131_vm0, %v537_v2  ;;  %278 = vmatpush.bf16.msra.mxu2 %v547_v24 }
  0x1e   :  { %212 = vmatpush.bf16.msra.mxu1 %v542_v6  ;;  %551 = vmatpush.bf16.msra.mxu3 %v542_v6 }
  0x20   :  { %279 = vmatpush.bf16.msra.mxu2 %v546_v25 }
  0x22   :  { %213 = vmatpush.bf16.msra.mxu1 %v541_v7  ;;  %552 = vmatpush.bf16.msra.mxu3 %v541_v7 }
  0x24   :  { %280 = vmatpush.bf16.msra.mxu2 %v545_v26 }
  0x2c   :  { %500 = vmatmul.msk.bf16.gmra.mxu0 %vm131_vm0, %v538_v3  ;;  %v844_v3 = vand.u32 127, %v320_v1 }
  0x2e   :  { %v847_v4 = vadd.s32 4294967288, %v844_v3 }
  0x99   :  { %v147_v8 = vpop.f32.mrf.mxu0 }
  0x9a   :  { %v148_v10 = vadd.f32 %v565_v9, %v147_v8 }
  0x9c   :  { %v157_v13 = vmax.f32 %v148_v10, 0.0 }
  0xa1   :  { %v149_v11 = vpop.f32.mrf.mxu0 }
  0xa2   :  { %v150_v12 = vadd.f32 %v565_v9, %v149_v11 }
  0xa4   :  { %v158_v14 = vmax.f32 %v150_v12, 0.0 }
  0xa6   :  { %v161_v15 = vpack.c.bf16 %v158_v14, %v157_v13 }
  0xa8   :  { %517 = vmatmul.msk.bf16.vlgmr.msra.gmra.mxu1 %vm199_vm1, %v161_v15  ;;  %v739_v15 = vmov 0  }
  0xa9   :  { %v152_v16 = vpop.f32.mrf.mxu0  ;;  %564 = vset.pattern.permute.xlu1 %v739_v15  ;;  %563 = vset.pattern.permute.xlu0 %v739_v15 }
  0xaa   :  { %v153_v17 = vadd.f32 %v565_v9, %v152_v16  ;;  %562 = vset.pattern.permute.xlu2 %v739_v15 }
  0xac   :  { %v159_v20 = vmax.f32 %v153_v17, 0.0 }
  0xb1   :  { %v154_v18 = vpop.f32.mrf.mxu0 }
  0xb2   :  { %v155_v19 = vadd.f32 %v565_v9, %v154_v18 }
  0xb4   :  { %v160_v21 = vmax.f32 %v155_v19, 0.0 }
  0xb6   :  { %v162_v22 = vpack.c.bf16 %v160_v21, %v159_v20 }
  0xb8   :  { %518 = vmatmul.msk.bf16.vlgmr.msra.gmra.mxu3 %vm199_vm1, %v162_v22 }
 0x125   :  { %v215_v27 = vpop.f32.mrf.mxu1 }
 0x126   :  { %v216_v29 = vadd.f32 %v566_v28, %v215_v27 }
 0x128   :  { %v225_v32 = vmax.f32 %v216_v29, 0.0 }
 0x12d   :  { %v217_v30 = vpop.f32.mrf.mxu1 }
 0x12e   :  { %v218_v31 = vadd.f32 %v566_v28, %v217_v30 }
 0x130   :  { %v226_v33 = vmax.f32 %v218_v31, 0.0 }
 0x132   :  { %v229_v34 = vpack.c.bf16 %v226_v33, %v225_v32 }
 0x134   :  { %535 = vmatmul.msk.bf16.vlgmr.msra.gmra.mxu2 %vm199_vm1, %v229_v34 }
 0x13b   :  { %v220_v35 = vpop.f32.mrf.mxu3 }
 0x13c   :  { %v221_v36 = vadd.f32 %v566_v28, %v220_v35 }
 0x13e   :  { %v227_v39 = vmax.f32 %v221_v36, 0.0 }
 0x143   :  { %v222_v37 = vpop.f32.mrf.mxu3 }
 0x144   :  { %v223_v38 = vadd.f32 %v566_v28, %v222_v37 }
 0x146   :  { %v228_v40 = vmax.f32 %v223_v38, 0.0 }
 0x148   :  { %v230_v41 = vpack.c.bf16 %v228_v40, %v227_v39 }
 0x14a   :  { %536 = vmatmul.msk.bf16.gmra.mxu2 %vm199_vm1, %v230_v41 }
 0x1b7   :  { %v282_v43 = vpop.f32.mrf.mxu2 }
 0x1b8   :  { %v817_v44 = vadd.f32 %v567_v42, %v282_v43 }
 0x1ba   :  { %v292_v46 = vmax.f32 %v817_v44, 0.0 }
 0x1bc   :  { %v300_v47 = vmul.f32 %v568_v45, %v292_v46 }
 0x1be   :  { %v304_v48 = vsel %vm199_vm1, %v300_v47, 0.0 }
 0x1bf   :  { %v284_v49 = vpop.f32.mrf.mxu2  ;;  %305 = vadd.xlane.f32.xlu0 %v304_v48 }
 0x1c0   :  { %v826_v50 = vadd.f32 %v567_v42, %v284_v49 }
 0x1c2   :  { %v293_v51 = vmax.f32 %v826_v50, 0.0 }
 0x1c4   :  { %v301_v52 = vmul.f32 %v568_v45, %v293_v51 }
 0x1c6   :  { %v307_v53 = vsel %vm199_vm1, %v301_v52, 0.0 }
 0x1c7   :  { %308 = vadd.xlane.f32.xlu0 %v307_v53 }
 0x1cd   :  { %v287_v54 = vpop.f32.mrf.mxu2 }
 0x1ce   :  { %v832_v55 = vadd.f32 %v567_v42, %v287_v54 }
 0x1d0   :  { %v294_v56 = vmax.f32 %v832_v55, 0.0 }
 0x1d2   :  { %v302_v57 = vmul.f32 %v568_v45, %v294_v56 }
 0x1d4   :  { %v310_v58 = vsel %vm199_vm1, %v302_v57, 0.0 }
 0x1d5   :  { %v289_v59 = vpop.f32.mrf.mxu2  ;;  %311 = vadd.xlane.f32.xlu1 %v310_v58 }
 0x1d6   :  { %v838_v60 = vadd.f32 %v567_v42, %v289_v59 }
 0x1d8   :  { %v295_v61 = vmax.f32 %v838_v60, 0.0 }
 0x1da   :  { %v303_v62 = vmul.f32 %v568_v45, %v295_v61 }
 0x1dc   :  { %v313_v63 = vsel %vm199_vm1, %v303_v62, 0.0 }
 0x1dd   :  { %314 = vadd.xlane.f32.xlu1 %v313_v63 }
 0x232   :  { %v306_v0 = vpop.xlane.xlu0 %305 }
 0x233   :  { %v322_v8 = vperm.slane %v306_v0, %v844_v3 }
 0x23a   :  { %v309_v5 = vpop.xlane.xlu0 %308 }
 0x23b   :  { %v324_v6 = vperm.slane %v309_v5, %v847_v4 }
 0x23d   :  { %v326_v11 = vsel %vm325_vm2, %v324_v6, %v322_v8 }
 0x248   :  { %v312_v2 = vpop.xlane.xlu1 %311 }
 0x249   :  { %v327_v9 = vperm.slane %v312_v2, %v844_v3 }
 0x250   :  { %v315_v7 = vpop.xlane.xlu1 %314 }
 0x251   :  { %v328_v10 = vperm.slane %v315_v7, %v847_v4 }
 0x253   :  { %v329_v12 = vsel %vm325_vm2, %v328_v10, %v327_v9 }
 0x254   :  { %v331_v13 = vsel %vm330_vm3, %v329_v12, %v326_v11 }
 0x255   :  { %v334_v14 = vsel %vm333_vm4, %v331_v13, -inf }
 0x256   :  { %335 = vmax.xlane.f32.xlu2 %v334_v14 }
 0x2c9   :  { %v336_v16 = vpop.xlane.xlu2 %335 }
 0x2ca   :  { %v338_v17 = vperm.slane %v336_v16, 0  ;;  %v339_v18 = vperm.slane %v336_v16, 1 }
 0x2cc   :  { %v342_v19 = vsub.f32 %v306_v0, %v338_v17  ;;  %v343_v20 = vsub.f32 %v309_v5, %v338_v17  ;;  %v344_v21 = vsub.f32 %v312_v2, %v339_v18  ;;  %v345_v25 = vsub.f32 %v315_v7, %v339_v18 }
 0x2ce   :  { %v346_v22 = vmul.f32 1.442695, %v342_v19  ;;  %v348_v23 = vmul.f32 1.442695, %v343_v20  ;;  %v350_v24 = vmul.f32 1.442695, %v344_v21 }
 0x2cf   :  { %v352_v26 = vmul.f32 1.442695, %v345_v25 }
 0x2d0   :  { %569 = vpow2.f32 %v346_v22 }
 0x2d1   :  { %571 = vpow2.f32 %v348_v23 }
 0x2d2   :  { %573 = vpow2.f32 %v350_v24 }
 0x2d3   :  { %575 = vpow2.f32 %v352_v26 }
 0x2d6   :  { %v570_v27 = vpop.eup %569 }
 0x2d7   :  { %v572_v28 = vpop.eup %571  ;;  %359 = vperm.xlu2 %562, %v570_v27  }
 0x2d8   :  { %v574_v29 = vpop.eup %573  ;;  %362 = vperm.xlu0 %563, %v572_v28  }
 0x2d9   :  { %365 = vperm.xlu1 %564, %v574_v29   ;;  %v576_v30 = vpop.eup %575 }
 0x2df   :  { %368 = vperm.xlu2 %562, %v576_v30  }
 0x331   :  { %v360_v31 = vpop.permute.xlu2 %359 }
 0x332   :  { %v370_v34 = vperm.slane %v360_v31, %v844_v3 }
 0x339   :  { %v369_v32 = vpop.permute.xlu2 %368 }
 0x33a   :  { %v374_v37 = vperm.slane %v369_v32, %v847_v4 }
 0x34a   :  { %v363_v33 = vpop.permute.xlu0 %362 }
 0x34b   :  { %v366_v35 = vpop.permute.xlu1 %365  ;;  %v371_v36 = vperm.slane %v363_v33, %v847_v4 }
 0x34c   :  { %v373_v38 = vperm.slane %v366_v35, %v844_v3 }
 0x34d   :  { %v372_v39 = vsel %vm325_vm2, %v371_v36, %v370_v34 }
 0x34e   :  { %v375_v40 = vsel %vm325_vm2, %v374_v37, %v373_v38 }
 0x34f   :  { %v376_v41 = vsel %vm330_vm3, %v375_v40, %v372_v39 }
 0x350   :  { %v378_v42 = vsel %vm333_vm4, %v376_v41, 0.0 }
 0x351   :  { %379 = vadd.xlane.f32.xlu2 %v378_v42 }
 0x3c4   :  { %v380_v43 = vpop.xlane.xlu2 %379 }
 0x3c5   :  { %577 = vrcp.f32 %v380_v43 }
 0x3cb   :  { %v578_v45 = vpop.eup %577 }
 0x3cc   :  { %v384_v47 = vperm.slane %v578_v45, 1  ;;  %v383_v48 = vperm.slane %v578_v45, 0 }
 0x3ce   :  { %v389_v49 = vmul.f32 %v574_v29, %v384_v47  ;;  %v387_v52 = vmul.f32 %v570_v27, %v383_v48  ;;  %v388_v53 = vmul.f32 %v572_v28, %v383_v48  ;;  %v390_v54 = vmul.f32 %v576_v30, %v384_v47 }
 0x3d0   :  { %402 = vperm.xlu0 %563, %v389_v49   ;;  %396 = vperm.xlu1 %564, %v387_v52  }
 0x3d8   :  { %399 = vperm.xlu1 %564, %v388_v53  }
 0x3e0   :  { %405 = vperm.xlu1 %564, %v390_v54  }
 0x442   :  { %v397_v57 = vpop.permute.xlu1 %396  ;;  %v403_v1 = vpop.permute.xlu0 %402 }
 0x443   :  { %v420_v58 = vmul.f32 %v397_v57, %v292_v46  ;;  %v422_v6 = vmul.f32 %v403_v1, %v294_v56  ;;  %v410_v44 = vperm.slane %v403_v1, %v844_v3  ;;  %v407_v46 = vperm.slane %v397_v57, %v844_v3 }
 0x445   :  { %v424_v63 = vsel %vm199_vm1, %v420_v58, 0.0  ;;  %v433_v55 = vsel %vm199_vm1, %v422_v6, 0.0 }
 0x44a   :  { %v400_v59 = vpop.permute.xlu1 %399 }
 0x44b   :  { %v421_v62 = vmul.f32 %v400_v59, %v293_v51  ;;  %v408_v7 = vperm.slane %v400_v59, %v847_v4 }
 0x44d   :  { %v425_v0 = vsel %vm199_vm1, %v421_v62, 0.0  ;;  %v409_v56 = vsel %vm325_vm2, %v408_v7, %v407_v46 }
 0x44e   :  { %v426_v2 = vadd.f32 %v425_v0, %v424_v63 }
 0x450   :  { %v427_v5 = vrot.slane %v426_v2, 4 }
 0x452   :  { %v428_v8 = vadd.f32 %v427_v5, %v426_v2  ;;  %v406_v9 = vpop.permute.xlu1 %405 }
 0x453   :  { %v411_v50 = vperm.slane %v406_v9, %v847_v4  ;;  %v423_v51 = vmul.f32 %v406_v9, %v295_v61 }
 0x454   :  { %v429_v12 = vrot.slane %v428_v8, 2 }
 0x455   :  { %v412_v10 = vsel %vm325_vm2, %v411_v50, %v410_v44  ;;  %v434_v11 = vsel %vm199_vm1, %v423_v51, 0.0 }
 0x456   :  { %v435_v13 = vadd.f32 %v434_v11, %v433_v55  ;;  %v413_v14 = vsel %vm330_vm3, %v412_v10, %v409_v56  ;;  %v430_v60 = vadd.f32 %v429_v12, %v428_v8 }
 0x457   :  { %415 = vst.msk [vmem:[#allocation11] sm:$0x3] %vm333_vm4, %v413_v14 }
 0x458   :  { %v436_v3 = vrot.slane %v435_v13, 4  ;;  %469 = dma.vmem_to_hbm [thread:$0]  %s465_s7, 32, %s467_s14, [#allocation12]   ;;  %v431_v15 = vrot.slane %v430_v60, 1 }
 0x45a   :  { %v437_v61 = vadd.f32 %v436_v3, %v435_v13  ;;  %v432_v19 = vadd.f32 %v431_v15, %v430_v60 }
 0x45c   :  { %v438_v4 = vrot.slane %v437_v61, 2 }
 0x45e   :  { %v439_v16 = vadd.f32 %v438_v4, %v437_v61 }
 0x460   :  { %v440_v17 = vrot.slane %v439_v16, 1 }
 0x462   :  { %v441_v18 = vadd.f32 %v440_v17, %v439_v16 }
 0x464   :  { %v444_v20 = vsel %vm330_vm3, %v441_v18, %v432_v19 }
 0x465   :  { %447 = vst.msk [vmem:[#allocation10] sm:$0x3] %vm446_vm5, %v444_v20 }
 0x466   :  { %458 = dma.vmem_to_hbm [thread:$0]  %s454_s15, 32, %s456_s18, [#allocation4]  }
 0x467   :  { %729 = dma.done.wait [#allocation4], 32  }
 0x468   :  { %730 = vsyncadd [#allocation4], 4294967264 }
 0x469   :  { %731 = dma.done.wait [#allocation12], 32  }
 0x46a   :  { %732 = vsyncadd [#allocation12], 4294967264 }
 0x46b   :  { %478 = vsyncpa [#allocation3], 1 }
 0x46c   :  { %479 = vsyncpa [#allocation6], 1 }
 0x46d   :  { %480 = vsyncpa [#allocation9], 1 }
 0x46e   :  { %481 = vsyncpa [#allocation4], 1 }
 0x46f   :  { %482 = vsyncpa [#allocation12], 1 }

</bundles_post_ra>
